<compile_context>
chip_gen: v5e
topology: v5e:2x2
jax: 0.10.0
libtpu: 0.0.40
codegen_flags: <defaults>
</compile_context>

<pallas_src>
import jax
import jax.numpy as jnp
from jax.experimental import pallas as pl
from jax.experimental.pallas import tpu as pltpu


LANES = 128
_BLOCK_BYTES_TARGET = 2 * 1024 * 1024   # ~2 MiB per input block (HBM-roofline sweet spot)
_VMEM_LIMIT_BYTES = 32 * 1024 * 1024    # 3 refs x 2 buffers x 2 MiB = 12 MiB << 32 MiB


# ----------------------------- Pallas kernel ------------------------------ #
def _residual_add_kernel(fx_ref, x_ref, o_ref):
    # Elementwise residual hot path: o = fn(x) + x for the current tile.
    o_ref[...] = fx_ref[...] + x_ref[...]


def _sublanes_for(dtype):
    # One f32 vreg row-group is 8 sublanes; sub-32-bit dtypes pack along sublanes.
    itemsize = jnp.dtype(dtype).itemsize
    return max(8, 32 // itemsize)       # 8 for f32, 16 for bf16, 32 for int8/fp8


def _pallas_residual_add(fx, x):
    """Compute fx + x with a Pallas TPU kernel. fx and x have identical shape/dtype."""
    assert fx.shape == x.shape and fx.dtype == x.dtype
    orig_shape = x.shape
    total = x.size
    dtype = x.dtype
    itemsize = jnp.dtype(dtype).itemsize
    sublanes = _sublanes_for(dtype)

    # Lane-dense view: last dim is always a full 128 lanes => unmasked stores.
    rows = pl.cdiv(total, LANES)

    # Row tile sized by VMEM byte budget, floored to a sublane multiple.
    budget_rows = max(
        sublanes,
        (_BLOCK_BYTES_TARGET // (LANES * itemsize)) // sublanes * sublanes,
    )

    # Keep at least 2 grid steps so v7x's two TensorCores both get work
    # (no cost on v5e/v6e, which have a single TC).
    if rows >= 2 * sublanes:
        half_rows = max(sublanes, (rows // 2) // sublanes * sublanes)
    else:
        half_rows = sublanes

    tile_rows = max(sublanes, min(budget_rows, half_rows))

    padded_rows = pl.cdiv(rows, tile_rows) * tile_rows
    padded_total = padded_rows * LANES
    grid = (padded_rows // tile_rows,)

    fx_flat = fx.reshape(-1)
    x_flat = x.reshape(-1)
    if padded_total != total:
        pad = padded_total - total
        fx_flat = jnp.pad(fx_flat, (0, pad))
        x_flat = jnp.pad(x_flat, (0, pad))

    fx2 = fx_flat.reshape(padded_rows, LANES)
    x2 = x_flat.reshape(padded_rows, LANES)

    out2 = pl.pallas_call(
        _residual_add_kernel,
        out_shape=jax.ShapeDtypeStruct((padded_rows, LANES), dtype),
        grid_spec=pltpu.PrefetchScalarGridSpec(
            num_scalar_prefetch=0,
            grid=grid,
            in_specs=[
                pl.BlockSpec((tile_rows, LANES), lambda i: (i, 0)),
                pl.BlockSpec((tile_rows, LANES), lambda i: (i, 0)),
            ],
            out_specs=pl.BlockSpec((tile_rows, LANES), lambda i: (i, 0)),
        ),
        # Write the sum in place over fn(x)'s buffer: no extra output allocation.
        input_output_aliases={0: 0},
        compiler_params=pltpu.CompilerParams(
            dimension_semantics=("parallel",),
            vmem_limit_bytes=_VMEM_LIMIT_BYTES,
        ),
    )(fx2, x2)

    out_flat = out2.reshape(-1)
    if padded_total != total:
        out_flat = out_flat[:total]
    return out_flat.reshape(orig_shape)


# ----------------------------- Residual module ----------------------------- #
class Residual:
    """JAX/Pallas port of DDPM Residual: forward(x, *a, **kw) = fn(x, *a, **kw) + x."""

    def __init__(self, fn):
        self.fn = fn

    def __call__(self, x, *args, **kwargs):
        fx = self.fn(x, *args, **kwargs)          # arbitrary wrapped block (plain JAX glue)
        return _pallas_residual_add(fx, x)        # residual add in the Pallas kernel


# ---------------------- deterministic example wrapped fn ------------------- #
def make_pointwise_conv_fn(key, channels, dtype=jnp.float32):
    """A simple deterministic 1x1 conv (NCHW) to stand in for the wrapped block."""
    wkey, bkey = jax.random.split(key)
    w = 0.1 * jax.random.normal(wkey, (channels, channels, 1, 1), dtype=dtype)  # OIHW
    b = 0.1 * jax.random.normal(bkey, (channels,), dtype=dtype)

    def fn(x):
        # x: NCHW
        y = jax.lax.conv_general_dilated(
            x, w,
            window_strides=(1, 1),
            padding="SAME",
            dimension_numbers=("NCHW", "OIHW", "NCHW"),
        )
        return y + b[None, :, None, None]

    return fn


# ---------------------------------- main ----------------------------------- #
if __name__ == "__main__":
    key = jax.random.PRNGKey(0)
    xkey, fkey = jax.random.split(key)

    N, C, H, W = 2, 4, 16, 16           # layout: NCHW
    x = jax.random.normal(xkey, (N, C, H, W), dtype=jnp.float32)

    fn = make_pointwise_conv_fn(fkey, C)
    residual = Residual(fn)

    out = residual(x)
    out = jax.block_until_ready(out)

    # Correctness check against the pure-JAX reference of fn(x) + x.
    ref = fn(x) + x
    assert out.shape == x.shape and out.dtype == x.dtype
    assert jnp.allclose(out, ref, atol=1e-5, rtol=1e-5)

    print("KERNEL_OK")
</pallas_src>

<mosaic_0001>
module attributes {stable_mosaic.version = 11 : i64} {
  func.func @_residual_add_kernel(%arg0: i32, %arg1: memref<8x128xf32, #tpu.memory_space<vmem>>, %arg2: memref<8x128xf32, #tpu.memory_space<vmem>>, %arg3: memref<8x128xf32, #tpu.memory_space<vmem>>) attributes {dimension_semantics = [#tpu.dimension_semantics<parallel>], iteration_bounds = array<i64: 2>, scalar_prefetch = 0 : i64, scratch_operands = 0 : i64, tpu.core_type = #tpu.core_type<tc>, window_params = [{transform_indices = @transform_0, window_bounds = array<i64: 8, 128>}, {transform_indices = @transform_1, window_bounds = array<i64: 8, 128>}, {transform_indices = @transform_2, window_bounds = array<i64: 8, 128>}]} {
    %c0 = arith.constant 0 : index
    %c0_0 = arith.constant 0 : index
    %0 = vector.load %arg1[%c0, %c0_0] : memref<8x128xf32, #tpu.memory_space<vmem>>, vector<8x128xf32>
    %c0_1 = arith.constant 0 : index
    %c0_2 = arith.constant 0 : index
    %1 = vector.load %arg2[%c0_1, %c0_2] : memref<8x128xf32, #tpu.memory_space<vmem>>, vector<8x128xf32>
    %2 = arith.addf %0, %1 : vector<8x128xf32>
    %c0_3 = arith.constant 0 : index
    %c0_4 = arith.constant 0 : index
    %3 = vector.load %arg3[%c0_3, %c0_4] : memref<8x128xf32, #tpu.memory_space<vmem>>, vector<8x128xf32>
    tpu.vector_store %arg3[%c0_3, %c0_4], %2 {strides = array<i32>} : memref<8x128xf32, #tpu.memory_space<vmem>>, vector<8x128xf32>,
    return
  }
  func.func @transform_0(%arg0: i32) -> (i32, i32) {
    %c0_i32 = arith.constant 0 : i32
    %c0_i32_0 = arith.constant 0 : i32
    return %arg0, %c0_i32 : i32, i32
  }
  func.func @transform_1(%arg0: i32) -> (i32, i32) {
    %c0_i32 = arith.constant 0 : i32
    %c0_i32_0 = arith.constant 0 : i32
    return %arg0, %c0_i32 : i32, i32
  }
  func.func @transform_2(%arg0: i32) -> (i32, i32) {
    %c0_i32 = arith.constant 0 : i32
    %c0_i32_0 = arith.constant 0 : i32
    return %arg0, %c0_i32 : i32, i32
  }
}

</mosaic_0001>

<bundles_post_ra>
// kernel: tpu_custom_call.1
= control target key start
LH: loop header
LB: loop body
LE: loop exit
PB: predicated region body
PF: predicated region fallthrough
CT: control target
= control target key end

     0   :  { %7 = vsyncpa [#allocation3], 0  ;;  %s584_s0 = inlined_call_operand.hbm [shape: f32[16,128], index: 0, kind: input, shape index: {}, may-alias: {0,2}]   ;;  %s585_s1 = inlined_call_operand.vmem [shape: f32[16,128], index: 1, kind: input, shape index: {}]   ;;  %s586_s2 = inlined_call_operand.hbm [shape: f32[16,128], index: 2, kind: output, shape index: {}, may-alias: {0,2}]  }
   0x1   :  { %9 = vsyncpa [#allocation3 + $0x1], 0 }
   0x2   :  { %10 = vsyncpa [#allocation4], 0 }
   0x3   :  { %12 = vsyncpa [#allocation4 + $0x1], 0  ;;  %s452_s9 = smov 0   ;;  %s454_s10 = smov 0  }
   0x4   :  { %s456_s11 = smov 0   ;;  %s458_s12 = smov 0  }
   0x5 LB: > { %s473_s13 = sadd.s32 4294967295, %s435_s12   ;;  %s280_s14 = sadd.s32 4294967294, %s435_s12   ;;  %s435_s12 = sphi %s458_s12, %s596_s12   ;;  %s431_s11 = sphi %s456_s11, %s595_s11   ;;  %s427_s10 = sphi %s454_s10, %s594_s10   ;;  %s423_s9 = sphi %s452_s9, %s593_s9  }
   0x6   : > { %s477_s15 = sadd.s32 1, %s435_s12   ;;  %s25_s16 = sadd.s32 1, %s431_s11 }
   0x7   : > { %s22_s17 = ssub.s32 %s435_s12, %s477_s15  ;;  %p32_p0 = scmp.ne.s32.totalorder %s431_s11, %s427_s10 }
   0x8   : > { %p23_p1 = scmp.eq.s32.totalorder %s22_s17, 0  ;;  %p33_p2 = scmp.eq.s32.totalorder %s435_s12, 0 }
   0x9   : > { %p38_p3 = scmp.ne.s32.totalorder %s427_s10, %s423_s9  ;;  %p39_p4 = scmp.eq.s32.totalorder %s473_s13, 0 }
   0xa   : > { %s489_s18 = scalar_select %p23_p1, %s431_s11, %s25_s16  }
   0xb   : > { %p491_p5 = por %p33_p2, %p32_p0  ;;  %p495_p6 = por %p39_p4, %p38_p3 }
   0xc   : > { %p88_p7 = scmp.eq.s32.totalorder %s473_s13, 1  ;;  %p94_p8 = scmp.eq.s32.totalorder %s280_s14, 1 }
   0xd   : > { %p305_p10 = scmp.lt.s32.totalorder %s435_s12, 2  ;;  %s114_s23 = sand.u32 1, %s431_s11  }
   0xe   : > { %p502_p11 = por %p88_p7, %p32_p0  ;;  %p506_p12 = por %p94_p8, %p38_p3 }
   0xf   : > { %s284_s24 = sshll.u32 %s435_s12, 3  ;;  %s283_s25 = sshll.u32 %s114_s23, 3 }
  0x10   : > { %s122_s28 = scalar_lea.hbm %s584_s0, %s284_s24  ;;  %s118_s30 = scalar_lea.vmem [#allocation2], %s283_s25 }
  0x11   : > { %s124_s29 = sshll.u32 %s122_s28, 4  ;;  %s126_s3 = sshll.u32 %s118_s30, 4  ;;  %s125_s29 = int_to_ptr.hbm [resolvable:$true] %s124_s29  ;;  %s127_s3 = int_to_ptr.vmem [resolvable:$true] %s126_s3 }
  0x12   : > { %p517_p13 = pnand %p305_p10, %p491_p5  ;;  %p285_p0 = scmp.ge.s32.totalorder %s435_s12, 1 }
  0x13   : > { %p138_p1 = scmp.lt.s32.totalorder %s435_s12, 3  ;;  %s115_s5 = scalar_lea.sflag [#allocation3], %s114_s23 }
  0x14   : > { %s339_s6 = sshra.s32 %s125_s29, 4  ;;  %p343_p3 = pneg %p517_p13  ;;  %s340_s6 = int_to_ptr.hbm [resolvable:$true] %s339_s6 }
  0x15   : > { %s341_s7 = scalar_lea.hbm %s340_s6, 8  ;;  %s346_s16 = scalar_lea.hbm %s584_s0, 16 }
  0x16   : > { %p342_p2 = scmp.ne.s32.totalorder %s340_s6, %s341_s7  ;;  %p347_p5 = scmp.lt.s32.totalorder %s340_s6, %s584_s0 }
  0x17   : > { %p348_p8 = scmp.lt.s32.totalorder %s346_s16, %s341_s7 }
  0x18   : > { %p344_p4 = pnand %p343_p3, %p342_p2 }
  0x19   : > { %p349_p10 = por %p348_p8, %p347_p5 }
  0x1a   : > { %p345_p7 = pneg %p344_p4 }
  0x1c   : > { %p350_p9 = pnand %p349_p10, %p345_p7 }
  0x1e   : > { %353 = shalt.err (!%p350_p9)
}
  0x1f   : > { %300 = dma.hbm_to_vmem [thread:$0]  (!%p517_p13), %s125_s29, 128, %s127_s3, %s115_s5  }
  0x20   : > { %p139_p2 = pnand %p285_p0, %p138_p1 }
  0x21   : > { %s538_s23 = sand.u32 (!%p139_p2), 1, %s427_s10  }
  0x22   : > { %142 = sbr.rel (%p139_p2) target bundleno = 57 (0x39), region = 28  ;;  %s286_s24 = sshll.u32 (!%p139_p2), %s538_s23, 3 }
  0x23   : > { %s145_s25 = scalar_lea.sflag (!%p139_p2), [#allocation3], %s538_s23  ;;  %s148_s26 = scalar_lea.vmem (!%p139_p2), [#allocation2], %s286_s24 }
  0x27   : > { %414 = dma.done.wait (%p495_p6), %s145_s25, 128  }
  0x28   : > { %416 = vsyncadd (%p495_p6), %s145_s25, 4294967168  ;;  %p174_p9 = scmp.lt.s32.totalorder %s473_s13, 1  ;;  %s173_s28 = scalar_lea.vmem [#allocation5], %s286_s24  ;;  %v178_v0 = vld [vmem:[%s148_s26] sm:$0xff] }
  0x29   : > { %s195_s29 = sshll.u32 %s173_s28, 4  ;;  %s290_s30 = sshll.u32 %s473_s13, 3  ;;  %s196_s29 = int_to_ptr.vmem [resolvable:$true] %s195_s29 }
  0x2a   : > { %s175_s27 = scalar_select %p174_p9, %s473_s13, 1 }
  0x2b   : > { %s193_s6 = scalar_lea.hbm %s586_s2, %s290_s30  ;;  %s183_s16 = scalar_lea.sflag [#allocation4], %s538_s23 }
  0x2c   : > { %s288_s3 = sshll.u32 %s175_s27, 3  ;;  %s197_s14 = sshll.u32 %s193_s6, 4  ;;  %s198_s14 = int_to_ptr.hbm [resolvable:$true] %s197_s14 }
  0x2d   : > { %s177_s20 = scalar_lea.vmem %s585_s1, %s288_s3  ;;  %s383_s17 = sshra.s32 %s198_s14, 4  ;;  %s384_s17 = int_to_ptr.hbm [resolvable:$true] %s383_s17 }
  0x2e   : > { %v179_v1 = vld [vmem:[%s177_s20] sm:$0xff]  ;;  %s385_s13 = scalar_lea.hbm %s384_s17, 8  ;;  %s389_s25 = scalar_lea.hbm %s586_s2, 16 }
  0x2f   : > { %v180_v2 = vadd.f32 %v179_v1, %v178_v0  ;;  %p386_p6 = scmp.ne.s32.totalorder %s384_s17, %s385_s13  ;;  %p390_p1 = scmp.lt.s32.totalorder %s384_s17, %s586_s2 }
  0x30   : > { %p391_p3 = scmp.lt.s32.totalorder %s389_s25, %s385_s13 }
  0x31   : > { %181 = vst [vmem:[%s173_s28] sm:$0xff] %v180_v2  ;;  %p387_p13 = pnand %p386_p6, %p502_p11 }
  0x32   : > { %p392_p4 = por %p391_p3, %p390_p1 }
  0x33   : > { %p388_p0 = pneg %p387_p13 }
  0x35   : > { %p393_p7 = pnand %p392_p4, %p388_p0 }
  0x37   : > { %396 = shalt.err (!%p393_p7)
}
  0x38   : > { %295 = dma.vmem_to_hbm [thread:$0]  (%p502_p11), %s196_s29, 128, %s198_s14, %s183_s16  }
  0x39 PF: > { %s209_s23 = sand.u32 1, %s423_s9   ;;  %p592_p5 = scmp.ge.s32.totalorder %s435_s12, 2 }
  0x3a   : > { %s210_s26 = scalar_lea.sflag [#allocation4], %s209_s23 }
  0x3b   : > { %p302_p8 = pnand %p592_p5, %p506_p12 }
  0x3d   : > { %p303_p10 = pneg %p302_p8 }
  0x3f   : > { %418 = dma.done.wait (%p303_p10), %s210_s26, 128  }
  0x40   : > { %420 = vsyncadd (%p303_p10), %s210_s26, 4294967168  ;;  %p15_p2 = scmp.ge.s32.totalorder %s477_s15, 4   ;;  %s593_s9 = smov %s427_s10 }
  0x41   : > { %s594_s10 = smov %s431_s11  ;;  %s595_s11 = smov %s489_s18 }
  0x42   : > { %s596_s12 = smov %s477_s15  ;;  %17 = sbr.rel (!%p15_p2) target bundleno = 5 (0x5), region = 76 }
  0x47   :  { %216 = vsyncpa [#allocation3], 1 }
  0x48   :  { %218 = vsyncpa [#allocation3 + $0x1], 1 }
  0x49   :  { %219 = vsyncpa [#allocation4], 1 }
  0x4a   :  { %221 = vsyncpa [#allocation4 + $0x1], 1 }

</bundles_post_ra>
